<compile_context>
chip_gen: v5e
topology: v5e:2x2
jax: 0.10.0
libtpu: 0.0.40
codegen_flags: <defaults>
</compile_context>

<pallas_src>
import functools

import numpy as np
import jax
import jax.numpy as jnp
from jax import lax
from jax.experimental import pallas as pl
from jax.experimental.pallas import tpu as pltpu

_BIG = 1e30


def _round_up(a, m):
    return -(-a // m) * m


def _dw_neighbour_kernel(tbl_ref, x_ref, tcol_ref, trow_ref, out_ref, *,
                         margin, tb, b_real):
    """One (slice k, anchor-row tile) step: mask -> normalize -> sim -> partial sums."""
    k = pl.program_id(0)
    nt = pl.program_id(1)
    bp, dp = x_ref.shape

    off = tbl_ref[k, 0]                      # slice column offset (SMEM scalar)
    wid = tbl_ref[k, 1]                      # slice width

    # Column mask selecting this slice's contiguous feature range [off, off+wid).
    d_iota = lax.broadcasted_iota(jnp.int32, (1, dp), 1)
    fmask = jnp.logical_and(d_iota >= off, d_iota < off + wid).astype(jnp.float32)

    # RHS: all anchors, masked to the slice columns, L2-normalized via EUP rsqrt.
    x = x_ref[...]                                       # (bp, dp) f32
    xm = x * fmask
    rinv = lax.rsqrt(jnp.maximum(jnp.sum(xm * xm, axis=1, keepdims=True), 1e-24))
    xn = xm * rinv

    # LHS: this step's anchor-row tile (re-normalized; negligible vs the matmul).
    row0 = pl.multiple_of(nt * tb, tb)
    qm = x_ref[pl.ds(row0, tb), :] * fmask               # (tb, dp)
    qinv = lax.rsqrt(jnp.maximum(jnp.sum(qm * qm, axis=1, keepdims=True), 1e-24))
    qn = qm * qinv

    # Cosine-similarity tile on the MXU (f32 operands, f32 accumulation).
    sim = lax.dot_general(qn, xn, (((1,), (1,)), ((), ())),
                          preferred_element_type=jnp.float32)   # (tb, bp)

    # Label / diagonal masks rebuilt from tiny label vectors (no (B,B) mask DMA).
    tc = tcol_ref[pl.ds(row0, tb), :]                    # (tb, 1) int32
    tr = trow_ref[...]                                   # (1, bp) int32
    r_idx = lax.broadcasted_iota(jnp.int32, (tb, 1), 0) + row0
    c_idx = lax.broadcasted_iota(jnp.int32, (1, bp), 1)

    same = tc == tr
    pos_b = jnp.logical_and(same, r_idx != c_idx)        # same label, off-diagonal
    neg_b = jnp.logical_not(same)
    if b_real != bp:                                     # static: only when padded
        col_ok = c_idx < b_real
        pos_b = jnp.logical_and(pos_b, col_ok)
        neg_b = jnp.logical_and(neg_b, col_ok)
    pos_f = pos_b.astype(jnp.float32)
    neg_f = neg_b.astype(jnp.float32)

    # Hardest positive / hardest negative per anchor.
    pos_min = jnp.min(jnp.where(pos_b, sim, _BIG), axis=1, keepdims=True)
    neg_max = jnp.max(jnp.where(neg_b, sim, -_BIG), axis=1, keepdims=True)

    # Fused hard-negative margin violation: one relu*mask pass gives viol and cnt.
    v = jnp.maximum(sim + margin - pos_min, 0.0) * neg_f
    cnt = jnp.sum((v > 0.0).astype(jnp.float32), axis=1, keepdims=True)
    loss_i = jnp.sum(v, axis=1, keepdims=True) * pl.reciprocal(
        jnp.maximum(cnt, 1.0), approx=True)

    # Row-wise masked sums reused for pos_d / neg_d (no extra whole-matrix passes).
    pos_row_cnt = jnp.sum(pos_f, axis=1, keepdims=True)
    neg_row_cnt = jnp.sum(neg_f, axis=1, keepdims=True)
    pos_row_sum = jnp.sum(sim * pos_f, axis=1, keepdims=True)
    neg_row_sum = jnp.sum(sim * neg_f, axis=1, keepdims=True)

    # Valid anchors: at least one in-batch positive (and not a padded row).
    valid = pos_row_cnt > 0.0
    if b_real != bp:
        valid = jnp.logical_and(valid, r_idx < b_real)
    valid_f = valid.astype(jnp.float32)

    loss_sum = jnp.sum(loss_i * valid_f)
    hit_sum = jnp.sum((neg_max < pos_min).astype(jnp.float32) * valid_f)
    n_valid = jnp.sum(valid_f)
    if b_real != bp:
        row_ok = (r_idx < b_real).astype(jnp.float32)
        pos_row_sum = pos_row_sum * row_ok
        pos_row_cnt = pos_row_cnt * row_ok
        neg_row_sum = neg_row_sum * row_ok
        neg_row_cnt = neg_row_cnt * row_ok
    pos_sum = jnp.sum(pos_row_sum)
    pos_cnt = jnp.sum(pos_row_cnt)
    neg_sum = jnp.sum(neg_row_sum)
    neg_cnt = jnp.sum(neg_row_cnt)

    # Pack 7 partial sums into lanes 0..6 of a lane-dense (1, 128) output row.
    lane = lax.broadcasted_iota(jnp.int32, (1, 128), 1)
    vals = jnp.where(lane == 0, loss_sum,
           jnp.where(lane == 1, hit_sum,
           jnp.where(lane == 2, n_valid,
           jnp.where(lane == 3, pos_sum,
           jnp.where(lane == 4, pos_cnt,
           jnp.where(lane == 5, neg_sum,
           jnp.where(lane == 6, neg_cnt, 0.0)))))))
    out_ref[0, 0] = vals.astype(jnp.float32)


def ensemble_dw_neighbour_loss(inputs, targets, *, margin=1.0,
                               nums=(0, 170, 171, 171), slice_key=None):
    """JAX/Pallas equivalent of EnsembleDWNeighbourLoss.forward."""
    dim = int(sum(nums))
    assert inputs.shape[1] == dim, "feature dim must equal sum(nums)"
    B = int(inputs.shape[0])
    K = len(nums) - 1

    # --- glue: deterministic replica of random_slice (random.shuffle ->
    # jax.random.permutation).  ONE gather; each slice is then a contiguous
    # column range [nums[i], nums[i] + nums[i+1]) of the permuted array
    # (including the original overlapping-slice indexing quirk).
    if slice_key is None:
        slice_key = jax.random.PRNGKey(1234)
    perm = jax.random.permutation(slice_key, dim)
    x_perm = inputs[:, perm].astype(jnp.float32)                 # (B, dim)

    offs = np.asarray([nums[i] for i in range(K)], dtype=np.int32)
    wids = np.asarray([nums[i + 1] for i in range(K)], dtype=np.int32)
    slice_tbl = jnp.asarray(np.stack([offs, wids], axis=1))      # (K, 2) int32

    # --- pad lanes (feature width) and sublanes/tiles (batch); padded rows get
    # label -1 and are masked out in-kernel.
    d_pad = _round_up(dim, 128)
    b8 = _round_up(B, 8)
    if b8 <= 128:
        tb = b8
        b_pad = b8
    else:
        tb = 128
        b_pad = _round_up(B, tb)
    nt = b_pad // tb

    x_p = jnp.pad(x_perm, ((0, b_pad - B), (0, d_pad - dim)))
    t = jnp.pad(targets.astype(jnp.int32), (0, b_pad - B), constant_values=-1)
    t_col = t.reshape(b_pad, 1)
    t_row = t.reshape(1, b_pad)

    # VMEM budget with headroom (guards v7x's 32 MiB scoped / 64 MiB physical).
    x_bytes = b_pad * d_pad * 4
    tile_bytes = tb * b_pad * 4
    vmem_est = 4 * x_bytes + 14 * tile_bytes + (2 << 20)
    vmem_limit = int(min(max(vmem_est, 32 << 20), 60 << 20))

    kernel = functools.partial(_dw_neighbour_kernel, margin=float(margin),
                               tb=tb, b_real=B)
    out = pl.pallas_call(
        kernel,
        out_shape=jax.ShapeDtypeStruct((K, nt, 1, 128), jnp.float32),
        grid_spec=pltpu.PrefetchScalarGridSpec(
            num_scalar_prefetch=1,                 # slice_tbl -> SMEM
            grid=(K, nt),
            in_specs=[
                # permuted features: resident, DMA'd once (block index constant)
                pl.BlockSpec((b_pad, d_pad), lambda k, r, tbl: (0, 0)),
                pl.BlockSpec((b_pad, 1), lambda k, r, tbl: (0, 0)),
                pl.BlockSpec((1, b_pad), lambda k, r, tbl: (0, 0)),
            ],
            out_specs=pl.BlockSpec((1, 1, 1, 128), lambda k, r, tbl: (k, r, 0, 0)),
        ),
        # Every (slice, row-tile) writes a distinct output block and carries no
        # state -> both axes parallel (load-balances v7x's 2 TensorCores; on
        # single-TC v5e/v6e it is simply a short serial loop).
        compiler_params=pltpu.CompilerParams(
            dimension_semantics=("parallel", "parallel"),
            vmem_limit_bytes=vmem_limit),
    )(slice_tbl, x_p, t_col, t_row)

    # Finish the reductions on the tiny (K, nt, 7) partial-sum tensor.
    part = out[:, :, 0, :7]                      # (K, nt, 7)
    s = jnp.sum(part, axis=1)                    # (K, 7) per-slice sums
    loss_k = s[:, 0] / jnp.maximum(s[:, 2], 1.0)
    prec_k = s[:, 1] / jnp.maximum(s[:, 2], 1.0)
    pos_d_k = s[:, 3] / jnp.maximum(s[:, 4], 1.0)
    neg_d_k = s[:, 5] / jnp.maximum(s[:, 6], 1.0)

    loss = jnp.mean(loss_k)                      # torch.mean(torch.cat(loss_list))
    acc = jnp.mean(prec_k)                       # np.mean(prec_list)
    pos_d = jnp.mean(pos_d_k)                    # np.mean(pos_d_list)
    neg_d = jnp.mean(neg_d_k)                    # np.mean(neg_d_list)
    return loss, acc, pos_d, neg_d


if __name__ == "__main__":
    key = jax.random.PRNGKey(0)
    k_feat, k_slice = jax.random.split(key)

    # Small-shape analogue of nums=[0, 170, 171, 171] (feature dim 512):
    B = 8
    nums = (0, 10, 11, 11)        # feature dim = 32
    D = sum(nums)

    inputs = jax.random.normal(k_feat, (B, D), dtype=jnp.float32)
    # 4 identities x 2 instances, as in metric-learning batches.
    targets = jnp.array([0, 0, 1, 1, 2, 2, 3, 3], dtype=jnp.int32)

    loss, acc, pos_d, neg_d = ensemble_dw_neighbour_loss(
        inputs, targets, margin=1.0, nums=nums, slice_key=k_slice)
    jax.block_until_ready((loss, acc, pos_d, neg_d))
    print("KERNEL_OK")
</pallas_src>

<mosaic_0001>
module attributes {stable_mosaic.version = 11 : i64} {
  func.func @_dw_neighbour_kernel(%arg0: i32, %arg1: i32, %arg2: memref<3x2xi32, #tpu.memory_space<smem>>, %arg3: memref<8x128xf32, #tpu.memory_space<vmem>>, %arg4: memref<8x1xi32, #tpu.memory_space<vmem>>, %arg5: memref<1x8xi32, #tpu.memory_space<vmem>>, %arg6: memref<1x1x1x128xf32, #tpu.memory_space<vmem>>) attributes {dimension_semantics = [#tpu.dimension_semantics<parallel>, #tpu.dimension_semantics<parallel>], iteration_bounds = array<i64: 3, 1>, scalar_prefetch = 1 : i64, scratch_operands = 0 : i64, tpu.core_type = #tpu.core_type<tc>, window_params = [{pipeline_mode = #tpu.pipeline_mode<synchronous>, transform_indices = @transform_0, window_bounds = array<i64: 8, 128>}, {pipeline_mode = #tpu.pipeline_mode<synchronous>, transform_indices = @transform_1, window_bounds = array<i64: 8, 1>}, {pipeline_mode = #tpu.pipeline_mode<synchronous>, transform_indices = @transform_2, window_bounds = array<i64: 1, 8>}, {transform_indices = @transform_3, window_bounds = array<i64: 1, 1, 1, 128>}]} {
    %0 = arith.index_cast %arg0 : i32 to index
    %c0 = arith.constant 0 : index
    %1 = memref.load %arg2[%0, %c0] : memref<3x2xi32, #tpu.memory_space<smem>>
    %2 = arith.index_cast %arg0 : i32 to index
    %c1 = arith.constant 1 : index
    %3 = memref.load %arg2[%2, %c1] : memref<3x2xi32, #tpu.memory_space<smem>>
    %4 = tpu.iota {dimensions = array<i32: 1>} : vector<1x128xi32>
    %5 = vector.broadcast %1 : i32 to vector<1x128xi32>
    %6 = arith.cmpi sge, %4, %5 : vector<1x128xi32>
    %7 = arith.addi %1, %3 : i32
    %8 = vector.broadcast %7 : i32 to vector<1x128xi32>
    %9 = arith.cmpi slt, %4, %8 : vector<1x128xi32>
    %10 = arith.andi %6, %9 : vector<1x128xi1>
    %11 = arith.extui %10 : vector<1x128xi1> to vector<1x128xi32>
    %12 = arith.sitofp %11 : vector<1x128xi32> to vector<1x128xf32>
    %c0_0 = arith.constant 0 : index
    %c0_1 = arith.constant 0 : index
    %13 = vector.load %arg3[%c0_0, %c0_1] : memref<8x128xf32, #tpu.memory_space<vmem>>, vector<8x128xf32>
    %14 = vector.broadcast %12 : vector<1x128xf32> to vector<8x128xf32>
    %15 = arith.mulf %13, %14 : vector<8x128xf32>
    %16 = arith.mulf %15, %15 : vector<8x128xf32>
    %cst = arith.constant dense<0.000000e+00> : vector<8xf32>
    %17 = vector.multi_reduction <add>, %16, %cst [1] : vector<8x128xf32> to vector<8xf32>
    %18 = vector.shape_cast %17 : vector<8xf32> to vector<8x1xf32>
    %cst_2 = arith.constant 1.000000e-24 : f32
    %19 = vector.broadcast %cst_2 : f32 to vector<8x1xf32>
    %20 = arith.maximumf %18, %19 : vector<8x1xf32>
    %21 = math.rsqrt %20 : vector<8x1xf32>
    %22 = vector.broadcast %21 : vector<8x1xf32> to vector<8x128xf32>
    %23 = arith.mulf %15, %22 : vector<8x128xf32>
    %c8_i32 = arith.constant 8 : i32
    %24 = arith.muli %arg1, %c8_i32 : i32
    %25 = tpu.assume_multiple %24, 8 : i32
    %26 = arith.index_cast %25 : i32 to index
    %c0_3 = arith.constant 0 : index
    %27 = vector.load %arg3[%26, %c0_3] : memref<8x128xf32, #tpu.memory_space<vmem>>, vector<8x128xf32>
    %28 = vector.broadcast %12 : vector<1x128xf32> to vector<8x128xf32>
    %29 = arith.mulf %27, %28 : vector<8x128xf32>
    %30 = arith.mulf %29, %29 : vector<8x128xf32>
    %cst_4 = arith.constant dense<0.000000e+00> : vector<8xf32>
    %31 = vector.multi_reduction <add>, %30, %cst_4 [1] : vector<8x128xf32> to vector<8xf32>
    %32 = vector.shape_cast %31 : vector<8xf32> to vector<8x1xf32>
    %cst_5 = arith.constant 1.000000e-24 : f32
    %33 = vector.broadcast %cst_5 : f32 to vector<8x1xf32>
    %34 = arith.maximumf %32, %33 : vector<8x1xf32>
    %35 = math.rsqrt %34 : vector<8x1xf32>
    %36 = vector.broadcast %35 : vector<8x1xf32> to vector<8x128xf32>
    %37 = arith.mulf %29, %36 : vector<8x128xf32>
    %cst_6 = arith.constant dense<0.000000e+00> : vector<8x8xf32>
    %38 = tpu.matmul %37, %23, %cst_6 {dimension_numbers = #tpu.dot_dimension_numbers<[1], [1], [0], [0], [0, 0, 1, 0], [], []>} : vector<8x128xf32>, vector<8x128xf32>, vector<8x8xf32> -> vector<8x8xf32>
    %39 = arith.index_cast %25 : i32 to index
    %c0_7 = arith.constant 0 : index
    %40 = vector.load %arg4[%39, %c0_7] : memref<8x1xi32, #tpu.memory_space<vmem>>, vector<8x1xi32>
    %c0_8 = arith.constant 0 : index
    %c0_9 = arith.constant 0 : index
    %41 = vector.load %arg5[%c0_8, %c0_9] : memref<1x8xi32, #tpu.memory_space<vmem>>, vector<1x8xi32>
    %42 = tpu.iota {dimensions = array<i32: 0>} : vector<8x1xi32>
    %43 = vector.broadcast %25 : i32 to vector<8x1xi32>
    %44 = arith.addi %42, %43 : vector<8x1xi32>
    %45 = tpu.iota {dimensions = array<i32: 1>} : vector<1x8xi32>
    %46 = vector.broadcast %40 : vector<8x1xi32> to vector<8x8xi32>
    %47 = vector.broadcast %41 : vector<1x8xi32> to vector<8x8xi32>
    %48 = arith.cmpi eq, %46, %47 : vector<8x8xi32>
    %49 = vector.broadcast %44 : vector<8x1xi32> to vector<8x8xi32>
    %50 = vector.broadcast %45 : vector<1x8xi32> to vector<8x8xi32>
    %51 = arith.cmpi ne, %49, %50 : vector<8x8xi32>
    %52 = arith.andi %48, %51 : vector<8x8xi1>
    %cst_10 = arith.constant dense<true> : vector<8x8xi1>
    %53 = arith.xori %48, %cst_10 : vector<8x8xi1>
    %54 = arith.extui %52 : vector<8x8xi1> to vector<8x8xi32>
    %55 = arith.sitofp %54 : vector<8x8xi32> to vector<8x8xf32>
    %56 = arith.extui %53 : vector<8x8xi1> to vector<8x8xi32>
    %57 = arith.sitofp %56 : vector<8x8xi32> to vector<8x8xf32>
    %cst_11 = arith.constant 1.000000e+30 : f32
    %58 = vector.broadcast %cst_11 : f32 to vector<8x8xf32>
    %59 = arith.select %52, %38, %58 : vector<8x8xi1>, vector<8x8xf32>
    %cst_12 = arith.constant dense<0x7F800000> : vector<8xf32>
    %60 = vector.multi_reduction <minimumf>, %59, %cst_12 [1] : vector<8x8xf32> to vector<8xf32>
    %61 = vector.shape_cast %60 : vector<8xf32> to vector<8x1xf32>
    %cst_13 = arith.constant -1.000000e+30 : f32
    %62 = vector.broadcast %cst_13 : f32 to vector<8x8xf32>
    %63 = arith.select %53, %38, %62 : vector<8x8xi1>, vector<8x8xf32>
    %cst_14 = arith.constant dense<0xFF800000> : vector<8xf32>
    %64 = vector.multi_reduction <maximumf>, %63, %cst_14 [1] : vector<8x8xf32> to vector<8xf32>
    %65 = vector.shape_cast %64 : vector<8xf32> to vector<8x1xf32>
    %cst_15 = arith.constant 1.000000e+00 : f32
    %66 = vector.broadcast %cst_15 : f32 to vector<8x8xf32>
    %67 = arith.addf %38, %66 : vector<8x8xf32>
    %68 = vector.broadcast %61 : vector<8x1xf32> to vector<8x8xf32>
    %69 = arith.subf %67, %68 : vector<8x8xf32>
    %cst_16 = arith.constant 0.000000e+00 : f32
    %70 = vector.broadcast %cst_16 : f32 to vector<8x8xf32>
    %71 = arith.maximumf %69, %70 : vector<8x8xf32>
    %72 = arith.mulf %71, %57 : vector<8x8xf32>
    %cst_17 = arith.constant 0.000000e+00 : f32
    %73 = vector.broadcast %cst_17 : f32 to vector<8x8xf32>
    %74 = arith.cmpf ogt, %72, %73 : vector<8x8xf32>
    %75 = arith.extui %74 : vector<8x8xi1> to vector<8x8xi32>
    %76 = arith.sitofp %75 : vector<8x8xi32> to vector<8x8xf32>
    %cst_18 = arith.constant dense<0.000000e+00> : vector<8xf32>
    %77 = vector.multi_reduction <add>, %76, %cst_18 [1] : vector<8x8xf32> to vector<8xf32>
    %78 = vector.shape_cast %77 : vector<8xf32> to vector<8x1xf32>
    %cst_19 = arith.constant dense<0.000000e+00> : vector<8xf32>
    %79 = vector.multi_reduction <add>, %72, %cst_19 [1] : vector<8x8xf32> to vector<8xf32>
    %80 = vector.shape_cast %79 : vector<8xf32> to vector<8x1xf32>
    %cst_20 = arith.constant 1.000000e+00 : f32
    %81 = vector.broadcast %cst_20 : f32 to vector<8x1xf32>
    %82 = arith.maximumf %78, %81 : vector<8x1xf32>
    %83 = tpu.reciprocal %82 {approx = true} : vector<8x1xf32> -> vector<8x1xf32>
    %84 = arith.mulf %80, %83 : vector<8x1xf32>
    %cst_21 = arith.constant dense<0.000000e+00> : vector<8xf32>
    %85 = vector.multi_reduction <add>, %55, %cst_21 [1] : vector<8x8xf32> to vector<8xf32>
    %86 = vector.shape_cast %85 : vector<8xf32> to vector<8x1xf32>
    %cst_22 = arith.constant dense<0.000000e+00> : vector<8xf32>
    %87 = vector.multi_reduction <add>, %57, %cst_22 [1] : vector<8x8xf32> to vector<8xf32>
    %88 = vector.shape_cast %87 : vector<8xf32> to vector<8x1xf32>
    %89 = arith.mulf %38, %55 : vector<8x8xf32>
    %cst_23 = arith.constant dense<0.000000e+00> : vector<8xf32>
    %90 = vector.multi_reduction <add>, %89, %cst_23 [1] : vector<8x8xf32> to vector<8xf32>
    %91 = vector.shape_cast %90 : vector<8xf32> to vector<8x1xf32>
    %92 = arith.mulf %38, %57 : vector<8x8xf32>
    %cst_24 = arith.constant dense<0.000000e+00> : vector<8xf32>
    %93 = vector.multi_reduction <add>, %92, %cst_24 [1] : vector<8x8xf32> to vector<8xf32>
    %94 = vector.shape_cast %93 : vector<8xf32> to vector<8x1xf32>
    %cst_25 = arith.constant 0.000000e+00 : f32
    %95 = vector.broadcast %cst_25 : f32 to vector<8x1xf32>
    %96 = arith.cmpf ogt, %86, %95 : vector<8x1xf32>
    %97 = arith.extui %96 : vector<8x1xi1> to vector<8x1xi32>
    %98 = arith.sitofp %97 : vector<8x1xi32> to vector<8x1xf32>
    %99 = arith.mulf %84, %98 : vector<8x1xf32>
    %100 = vector.shape_cast %99 : vector<8x1xf32> to vector<1x8x1xf32>
    %cst_26 = arith.constant dense<0.000000e+00> : vector<1xf32>
    %101 = vector.multi_reduction <add>, %100, %cst_26 [1, 2] : vector<1x8x1xf32> to vector<1xf32>
    %102 = vector.shape_cast %101 : vector<1xf32> to vector<1x1x1xf32>
    %103 = vector.extract %102[0, 0, 0] : f32 from vector<1x1x1xf32>
    %104 = arith.cmpf olt, %65, %61 : vector<8x1xf32>
    %105 = arith.extui %104 : vector<8x1xi1> to vector<8x1xi32>
    %106 = arith.sitofp %105 : vector<8x1xi32> to vector<8x1xf32>
    %107 = arith.mulf %106, %98 : vector<8x1xf32>
    %108 = vector.shape_cast %107 : vector<8x1xf32> to vector<1x8x1xf32>
    %cst_27 = arith.constant dense<0.000000e+00> : vector<1xf32>
    %109 = vector.multi_reduction <add>, %108, %cst_27 [1, 2] : vector<1x8x1xf32> to vector<1xf32>
    %110 = vector.shape_cast %109 : vector<1xf32> to vector<1x1x1xf32>
    %111 = vector.extract %110[0, 0, 0] : f32 from vector<1x1x1xf32>
    %112 = vector.shape_cast %98 : vector<8x1xf32> to vector<1x8x1xf32>
    %cst_28 = arith.constant dense<0.000000e+00> : vector<1xf32>
    %113 = vector.multi_reduction <add>, %112, %cst_28 [1, 2] : vector<1x8x1xf32> to vector<1xf32>
    %114 = vector.shape_cast %113 : vector<1xf32> to vector<1x1x1xf32>
    %115 = vector.extract %114[0, 0, 0] : f32 from vector<1x1x1xf32>
    %116 = vector.shape_cast %91 : vector<8x1xf32> to vector<1x8x1xf32>
    %cst_29 = arith.constant dense<0.000000e+00> : vector<1xf32>
    %117 = vector.multi_reduction <add>, %116, %cst_29 [1, 2] : vector<1x8x1xf32> to vector<1xf32>
    %118 = vector.shape_cast %117 : vector<1xf32> to vector<1x1x1xf32>
    %119 = vector.extract %118[0, 0, 0] : f32 from vector<1x1x1xf32>
    %120 = vector.shape_cast %86 : vector<8x1xf32> to vector<1x8x1xf32>
    %cst_30 = arith.constant dense<0.000000e+00> : vector<1xf32>
    %121 = vector.multi_reduction <add>, %120, %cst_30 [1, 2] : vector<1x8x1xf32> to vector<1xf32>
    %122 = vector.shape_cast %121 : vector<1xf32> to vector<1x1x1xf32>
    %123 = vector.extract %122[0, 0, 0] : f32 from vector<1x1x1xf32>
    %124 = vector.shape_cast %94 : vector<8x1xf32> to vector<1x8x1xf32>
    %cst_31 = arith.constant dense<0.000000e+00> : vector<1xf32>
    %125 = vector.multi_reduction <add>, %124, %cst_31 [1, 2] : vector<1x8x1xf32> to vector<1xf32>
    %126 = vector.shape_cast %125 : vector<1xf32> to vector<1x1x1xf32>
    %127 = vector.extract %126[0, 0, 0] : f32 from vector<1x1x1xf32>
    %128 = vector.shape_cast %88 : vector<8x1xf32> to vector<1x8x1xf32>
    %cst_32 = arith.constant dense<0.000000e+00> : vector<1xf32>
    %129 = vector.multi_reduction <add>, %128, %cst_32 [1, 2] : vector<1x8x1xf32> to vector<1xf32>
    %130 = vector.shape_cast %129 : vector<1xf32> to vector<1x1x1xf32>
    %131 = vector.extract %130[0, 0, 0] : f32 from vector<1x1x1xf32>
    %132 = tpu.iota {dimensions = array<i32: 1>} : vector<1x128xi32>
    %c0_i32 = arith.constant 0 : i32
    %133 = vector.broadcast %c0_i32 : i32 to vector<1x128xi32>
    %134 = arith.cmpi eq, %132, %133 : vector<1x128xi32>
    %c1_i32 = arith.constant 1 : i32
    %135 = vector.broadcast %c1_i32 : i32 to vector<1x128xi32>
    %136 = arith.cmpi eq, %132, %135 : vector<1x128xi32>
    %c2_i32 = arith.constant 2 : i32
    %137 = vector.broadcast %c2_i32 : i32 to vector<1x128xi32>
    %138 = arith.cmpi eq, %132, %137 : vector<1x128xi32>
    %c3_i32 = arith.constant 3 : i32
    %139 = vector.broadcast %c3_i32 : i32 to vector<1x128xi32>
    %140 = arith.cmpi eq, %132, %139 : vector<1x128xi32>
    %c4_i32 = arith.constant 4 : i32
    %141 = vector.broadcast %c4_i32 : i32 to vector<1x128xi32>
    %142 = arith.cmpi eq, %132, %141 : vector<1x128xi32>
    %c5_i32 = arith.constant 5 : i32
    %143 = vector.broadcast %c5_i32 : i32 to vector<1x128xi32>
    %144 = arith.cmpi eq, %132, %143 : vector<1x128xi32>
    %c6_i32 = arith.constant 6 : i32
    %145 = vector.broadcast %c6_i32 : i32 to vector<1x128xi32>
    %146 = arith.cmpi eq, %132, %145 : vector<1x128xi32>
    %cst_33 = arith.constant 0.000000e+00 : f32
    %147 = vector.broadcast %131 : f32 to vector<1x128xf32>
    %148 = vector.broadcast %cst_33 : f32 to vector<1x128xf32>
    %149 = arith.select %146, %147, %148 : vector<1x128xi1>, vector<1x128xf32>
    %150 = vector.broadcast %127 : f32 to vector<1x128xf32>
    %151 = arith.select %144, %150, %149 : vector<1x128xi1>, vector<1x128xf32>
    %152 = vector.broadcast %123 : f32 to vector<1x128xf32>
    %153 = arith.select %142, %152, %151 : vector<1x128xi1>, vector<1x128xf32>
    %154 = vector.broadcast %119 : f32 to vector<1x128xf32>
    %155 = arith.select %140, %154, %153 : vector<1x128xi1>, vector<1x128xf32>
    %156 = vector.broadcast %115 : f32 to vector<1x128xf32>
    %157 = arith.select %138, %156, %155 : vector<1x128xi1>, vector<1x128xf32>
    %158 = vector.broadcast %111 : f32 to vector<1x128xf32>
    %159 = arith.select %136, %158, %157 : vector<1x128xi1>, vector<1x128xf32>
    %160 = vector.broadcast %103 : f32 to vector<1x128xf32>
    %161 = arith.select %134, %160, %159 : vector<1x128xi1>, vector<1x128xf32>
    %c0_34 = arith.constant 0 : index
    %c0_35 = arith.constant 0 : index
    %c0_36 = arith.constant 0 : index
    %c0_37 = arith.constant 0 : index
    %162 = vector.load %arg6[%c0_34, %c0_35, %c0_36, %c0_37] : memref<1x1x1x128xf32, #tpu.memory_space<vmem>>, vector<1x1x1x128xf32>
    %163 = vector.shape_cast %162 : vector<1x1x1x128xf32> to vector<1x128xf32>
    %164 = vector.shape_cast %161 : vector<1x128xf32> to vector<1x1x1x128xf32>
    tpu.vector_store %arg6[%c0_34, %c0_35, %c0_36, %c0_37], %164 {strides = array<i32>} : memref<1x1x1x128xf32, #tpu.memory_space<vmem>>, vector<1x1x1x128xf32>,
    return
  }
  func.func @transform_0(%arg0: i32, %arg1: i32, %arg2: memref<3x2xi32, #tpu.memory_space<smem>>) -> (i32, i32) {
    %c0_i32 = arith.constant 0 : i32
    %c0_i32_0 = arith.constant 0 : i32
    %c0_i32_1 = arith.constant 0 : i32
    return %c0_i32, %c0_i32_0 : i32, i32
  }
  func.func @transform_1(%arg0: i32, %arg1: i32, %arg2: memref<3x2xi32, #tpu.memory_space<smem>>) -> (i32, i32) {
    %c0_i32 = arith.constant 0 : i32
    %c0_i32_0 = arith.constant 0 : i32
    %c0_i32_1 = arith.constant 0 : i32
    return %c0_i32, %c0_i32_0 : i32, i32
  }
  func.func @transform_2(%arg0: i32, %arg1: i32, %arg2: memref<3x2xi32, #tpu.memory_space<smem>>) -> (i32, i32) {
    %c0_i32 = arith.constant 0 : i32
    %c0_i32_0 = arith.constant 0 : i32
    %c0_i32_1 = arith.constant 0 : i32
    return %c0_i32, %c0_i32_0 : i32, i32
  }
  func.func @transform_3(%arg0: i32, %arg1: i32, %arg2: memref<3x2xi32, #tpu.memory_space<smem>>) -> (i32, i32, i32, i32) {
    %c0_i32 = arith.constant 0 : i32
    %c0_i32_0 = arith.constant 0 : i32
    %c0_i32_1 = arith.constant 0 : i32
    return %arg0, %arg1, %c0_i32, %c0_i32_0 : i32, i32, i32, i32
  }
}

</mosaic_0001>

<bundles_post_ra>
// kernel: tpu_custom_call.1
= control target key start
LH: loop header
LB: loop body
LE: loop exit
PB: predicated region body
PF: predicated region fallthrough
CT: control target
= control target key end

     0   :  { %s659_s18 = smov [#allocation3]   ;;  %s836_s0 = inlined_call_operand.vmem [shape: s32[3,2], index: 0, kind: input, shape index: {}]   ;;  %s837_s1 = inlined_call_operand.vmem [shape: f32[8,128], index: 1, kind: input, shape index: {}]   ;;  %s838_s2 = inlined_call_operand.vmem [shape: s32[8,1], index: 2, kind: input, shape index: {}]   ;;  %s839_s3 = inlined_call_operand.vmem [shape: s32[1,8], index: 3, kind: input, shape index: {}]   ;;  %s840_s4 = inlined_call_operand.hbm [shape: f32[3,1,1,128], index: 4, kind: output, shape index: {}]  }
   0x1   :  { %s10_s17 = sshll.u32 %s836_s0, 4  ;;  %s11_s17 = int_to_ptr.vmem [resolvable:$true] %s10_s17 }
   0x2   :  { %13 = dma.vmem_to_smem %s11_s17, 64, %s659_s18, [#allocation2] }
   0x3   :  { %629 = dma.done.wait [#allocation2], 64 }
   0x4   :  { %630 = vsyncadd [#allocation2], 4294967232 }
   0x5   :  { %16 = sfence }
   0x6   :  { %17 = vsyncpa [#allocation5], 0 }
   0x7   :  { %19 = vsyncpa [#allocation5 + $0x1], 0  ;;  %s691_s19 = smov 0   ;;  %s693_s20 = smov 0  }
   0x8   :  { %s695_s21 = smov 0   ;;  %s697_s22 = smov 0  }
   0x9   :  { %s699_s23 = smov 0   ;;  %s701_s24 = smov 0  }
   0xa LB: > { %s470_s0 = sadd.s32 4294967295, %s657_s24   ;;  %s471_s25 = sadd.s32 4294967294, %s657_s24   ;;  %s657_s24 = sphi %s701_s24, %s25_s24   ;;  %s653_s23 = sphi %s699_s23, %s847_s23   ;;  %s649_s22 = sphi %s697_s22, %s846_s22   ;;  %s645_s21 = sphi %s695_s21, %s845_s21   ;;  %s641_s20 = sphi %s693_s20, %s844_s20   ;;  %s637_s19 = sphi %s691_s19, %s843_s19  }
   0xb   : > { %s37_s26 = sadd.s32 1, %s653_s23  ;;  %s109_s27 = sadd.s32 1, %s645_s21 }
   0xc   : > { %p39_p0 = scmp.ge.s32.totalorder %s37_s26, 3  ;;  %p119_p1 = scmp.ne.s32.totalorder %s645_s21, %s641_s20 }
   0xd   : > { %p120_p2 = scmp.eq.s32.totalorder %s470_s0, 2  ;;  %p125_p3 = scmp.ne.s32.totalorder %s641_s20, %s637_s19 }
   0xe   : > { %s849_s26 = smov (%p39_p0, %s37_s26), 0  ;;  %p126_p5 = scmp.eq.s32.totalorder %s471_s25, 2 }
   0xf   : > { %p731_p4 = por %p120_p2, %p119_p1  ;;  %s104_s29 = ssub.s32 %s653_s23, %s849_s26 }
  0x10   : > { %p473_p6 = scmp.ge.s32.totalorder %s657_s24, 1  ;;  %p107_p7 = scmp.eq.s32.totalorder %s104_s29, 0 }
  0x11   : > { %p738_p8 = por %p126_p5, %p125_p3  ;;  %p153_p9 = scmp.lt.s32.totalorder %s657_s24, 4 }
  0x12   : > { %s744_s5 = scalar_select %p107_p7, %s645_s21, %s109_s27  }
  0x13   : > { %p154_p10 = pnand %p473_p6, %p153_p9 }
  0x14   : > { %s474_s6 = sshll.u32 (!%p154_p10), %s649_s22, 7  ;;  %s169_s29 = sand.u32 (!%p154_p10), 1, %s641_s20  }
  0x15   : > { %157 = sbr.rel (%p154_p10) target bundleno = 771 (0x303), region = 32  ;;  %s172_s7 = sld [smem:[#allocation3 + %s474_s6]] (!%p154_p10) }
  0x16   : > { %s173_s8 = sadd.s32 (!%p154_p10), 1, %s474_s6  ;;  %s170_s11 = scalar_lea.vmem (!%p154_p10), [#allocation4], %s169_s29 }
  0x17   : > { %s174_s9 = sld [smem:[#allocation3 + %s173_s8]] (!%p154_p10)  ;;  %s412_s12 = sshll.u32 (!%p154_p10), %s170_s11, 4  ;;  %s413_s12 = int_to_ptr.vmem [resolvable:$true] %s412_s12 }
  0x1a   : > { %v175_v0 = vlaneseq  ;;  %v185_v4 = vld [vmem:[%s837_s1] sm:$0xff]  ;;  %v660_v5 = vmov 0.0   ;;  %v661_v11 = vmov 0   ;;  %vm662_vm11 = vmmov 1  }
  0x1b   : > { %v177_v2 = vstv %s172_s7  ;;  %v242_v9 = vld [vmem:[%s838_s2] sm:$0xff]  ;;  %556 = vset.pattern.permute.xlu1 %v661_v11  ;;  %557 = vset.pattern.permute.xlu0 %v661_v11  ;;  %vm261_vm14 = vcmask 64512  }
  0x1c   : > { %v747_v1 = vand.u32 127, %v175_v0  ;;  %249 = vperm.xlu1 %556, %v242_v9   ;;  %v558_v31 = vld [vmem:[%s839_s3] ss:$0 sm:$0xff]  ;;  %v245_v33 = vshrl.u32 %v175_v0, 7 }
  0x1d   : > { %s179_s10 = sadd.s32 %s174_s9, %s172_s7 }
  0x1e   : > { %vm178_vm0 = vcmp.ge.s32.totalorder %v747_v1, %v177_v2  ;;  %v180_v3 = vstv %s179_s10  ;;  %vm253_vm10 = vcmp.ne.s32.totalorder %v245_v33, %v747_v1  ;;  %s410_s10 = scalar_lea.hbm %s840_s4, %s649_s22  ;;  %s401_s22 = scalar_lea.sflag [#allocation5], %s169_s29 }
  0x1f   : > { %vm181_vm1 = vcmp.lt.s32.totalorder %v747_v1, %v180_v3  ;;  %s414_s13 = sshll.u32 %s410_s10, 4  ;;  %s415_s13 = int_to_ptr.hbm [resolvable:$true] %s414_s13 }
  0x20   : > { %vm182_vm2 = vmand %vm178_vm0, %vm181_vm1  ;;  %s591_s14 = sshra.s32 %s415_s13, 4  ;;  %s592_s14 = int_to_ptr.hbm [resolvable:$true] %s591_s14 }
  0x21   : > { %v475_v6 = vsel %vm182_vm2, 1.0, %v660_v5  ;;  %vm303_vm2 = vcmask 7168   ;;  %s593_s15 = scalar_lea.hbm %s592_s14, 1  ;;  %p598_p0 = scmp.lt.s32.totalorder %s592_s14, %s840_s4 }
  0x22   : > { %v186_v7 = vmul.f32 %v475_v6, %v185_v4  ;;  %p594_p11 = scmp.ne.s32.totalorder %s592_s14, %s593_s15 }
  0x24   : > { %v187_v8 = vmul.f32 %v186_v7, %v186_v7  ;;  %p595_p12 = pnand %p594_p11, %p731_p4 }
  0x26   : > { %188 = vadd.xlane.f32.xlu0 %v187_v8  ;;  %p596_p13 = pneg %p595_p12 }
  0x2e   : > { %207 = vadd.xlane.f32.xlu0 %v187_v8 }
  0x8e   : > { %v250_v32 = vpop.permute.xlu1 %249 }
  0x8f   : > { %vm252_vm9 = vcmp.eq.s32.totalorder %v250_v32, %v558_v31 }
  0x90   : > { %vm255_vm12 = vmxor %vm252_vm9, %vm662_vm11 }
  0x91   : > { %vm254_vm13 = vmand %vm252_vm9, %vm253_vm10  ;;  %v477_v34 = vsel %vm255_vm12, 1.0, %v660_v5  ;;  %vm378_vm9 = vcmp.eq.s32.totalorder %v747_v1, 0 }
  0x92   : > { %v476_v35 = vsel %vm254_vm13, 1.0, %v660_v5  ;;  %v288_v51 = vsel %vm261_vm14, %v477_v34, 0.0 }
  0x93   : > { %v285_v52 = vsel %vm261_vm14, %v476_v35, 0.0 }
  0x99   : > { %v189_v10 = vpop.xlane.xlu0 %188 }
  0x9a   : > { %v190_v12 = vmax.f32 %v189_v10, 1e-24 }
  0x9c   : > { %559 = vrsqrt.f32 %v190_v12  ;;  %vm197_vm4 = vweird.f32 %v190_v12 }
  0xa1   : > { %v208_v13 = vpop.xlane.xlu0 %207 }
  0xa2   : > { %v560_v14 = vpop.eup %559  ;;  %v209_v15 = vmax.f32 %v208_v13, 1e-24 }
  0xa3   : > { %v192_v16 = vmul.f32 %v560_v14, %v190_v12  ;;  %vm198_vm3 = vweird.f32 %v560_v14 }
  0xa4   : > { %561 = vrsqrt.f32 %v209_v15  ;;  %vm199_vm5 = vmor %vm197_vm4, %vm198_vm3  ;;  %vm216_vm7 = vweird.f32 %v209_v15  ;;  %vm384_vm3 = vcmp.eq.s32.totalorder %v747_v1, 6  ;;  %vm383_vm4 = vcmp.eq.s32.totalorder %v747_v1, 5 }
  0xa5   : > { %v193_v17 = vmul.f32 %v560_v14, %v192_v16 }
  0xa7   : > { %v194_v18 = vmul.f32 0.5, %v193_v17 }
  0xa9   : > { %v195_v19 = vsub.f32 1.5, %v194_v18 }
  0xaa   : > { %v562_v20 = vpop.eup %561 }
  0xab   : > { %v211_v21 = vmul.f32 %v562_v20, %v209_v15  ;;  %v196_v22 = vmul.f32 %v560_v14, %v195_v19  ;;  %vm217_vm6 = vweird.f32 %v562_v20 }
  0xac   : > { %vm218_vm8 = vmor %vm216_vm7, %vm217_vm6  ;;  %vm381_vm6 = vcmp.eq.s32.totalorder %v747_v1, 3  ;;  %vm380_vm7 = vcmp.eq.s32.totalorder %v747_v1, 2 }
  0xad   : > { %v212_v23 = vmul.f32 %v562_v20, %v211_v21  ;;  %v200_v24 = vsel %vm199_vm5, %v560_v14, %v196_v22  ;;  %vm382_vm5 = vcmp.eq.s32.totalorder %v747_v1, 4 }
  0xae   : > { %v201_v25 = vmul.f32 %v200_v24, %v186_v7 }
  0xaf   : > { %v213_v26 = vmul.f32 0.5, %v212_v23 }
  0xb0   : > { %236 = vmatpush.xpose.msra.mxu0 %v201_v25 }
  0xb1   : > { %v214_v27 = vsub.f32 1.5, %v213_v26 }
  0xb3   : > { %v215_v28 = vmul.f32 %v562_v20, %v214_v27 }
  0xb5   : > { %v219_v29 = vsel %vm218_vm8, %v562_v20, %v215_v28  ;;  %vm379_vm8 = vcmp.eq.s32.totalorder %v747_v1, 1 }
  0xb6   : > { %v220_v30 = vmul.f32 %v219_v29, %v186_v7 }
  0xb8   : > { %237 = vmatmul.f32.vlgmr.msra.gmra.mxu0 %v220_v30 }
 0x135   : > { %v238_v36 = vpop.f32.mrf.mxu0 }
 0x136   : > { %v265_v37 = vsel %vm255_vm12, %v238_v36, -1e+30  ;;  %v260_v38 = vsel %vm254_vm13, %v238_v36, 1e+30  ;;  %v295_v39 = vmul.f32 %v477_v34, %v238_v36  ;;  %v291_v42 = vmul.f32 %v476_v35, %v238_v36 }
 0x137   : > { %v266_v40 = vsel %vm261_vm14, %v265_v37, -inf  ;;  %v262_v41 = vsel %vm261_vm14, %v260_v38, inf  ;;  %v269_v43 = vadd.f32 1.0, %v238_v36 }
 0x138   : > { %267 = vmax.xlane.f32.xlu2 %v266_v40  ;;  %263 = vmin.xlane.f32.xlu1 %v262_v41  ;;  %v296_v53 = vsel %vm261_vm14, %v295_v39, 0.0  ;;  %v292_v54 = vsel %vm261_vm14, %v291_v42, 0.0 }
 0x1ab   : > { %v264_v44 = vpop.xlane.xlu1 %263  ;;  %v268_v55 = vpop.xlane.xlu2 %267 }
 0x1ac   : > { %v270_v45 = vsub.f32 %v269_v43, %v264_v44  ;;  %vm314_vm0 = vcmp.lt.f32.partialorder %v268_v55, %v264_v44 }
 0x1ad   : > { %v480_v62 = vsel %vm314_vm0, 1.0, %v660_v5 }
 0x1ae   : > { %v271_v46 = vmax.f32 %v270_v45, 0.0 }
 0x1b0   : > { %v272_v47 = vmul.f32 %v477_v34, %v271_v46 }
 0x1b2   : > { %v279_v48 = vsel %vm261_vm14, %v272_v47, 0.0  ;;  %vm273_vm15 = vcmp.gt.f32.partialorder %v272_v47, 0.0 }
 0x1b3   : > { %280 = vadd.xlane.f32.xlu0 %v279_v48  ;;  %v478_v49 = vsel %vm273_vm15, 1.0, %v660_v5 }
 0x1b4   : > { %v276_v50 = vsel %vm261_vm14, %v478_v49, 0.0 }
 0x1b5   : > { %277 = vadd.xlane.f32.xlu2 %v276_v50 }
 0x1bb   : > { %289 = vadd.xlane.f32.xlu0 %v288_v51 }
 0x1bd   : > { %286 = vadd.xlane.f32.xlu2 %v285_v52 }
 0x1c3   : > { %297 = vadd.xlane.f32.xlu0 %v296_v53 }
 0x1c5   : > { %293 = vadd.xlane.f32.xlu2 %v292_v54 }
 0x226   : > { %v281_v56 = vpop.xlane.xlu0 %280 }
 0x228   : > { %v278_v57 = vpop.xlane.xlu2 %277 }
 0x229   : > { %v282_v58 = vmax.f32 %v278_v57, 1.0 }
 0x22b   : > { %563 = vrcp.f32 %v282_v58 }
 0x22e   : > { %v290_v59 = vpop.xlane.xlu0 %289 }
 0x22f   : > { %v368_v12 = vsel %vm303_vm2, %v290_v59, 0.0 }
 0x230   : > { %v287_v60 = vpop.xlane.xlu2 %286 }
 0x231   : > { %v564_v61 = vpop.eup %563  ;;  %vm299_vm1 = vcmp.gt.f32.partialorder %v287_v60, 0.0  ;;  %v348_v11 = vsel %vm303_vm2, %v287_v60, 0.0 }
 0x232   : > { %v479_v63 = vsel %vm299_vm1, 1.0, %v660_v5  ;;  %v284_v3 = vmul.f32 %v564_v61, %v281_v56 }
 0x233   : > { %v328_v0 = vsel %vm303_vm2, %v479_v63, 0.0  ;;  %v317_v2 = vmul.f32 %v480_v62, %v479_v63 }
 0x234   : > { %329 = vadd.xlane.f32.xlu2 %v328_v0  ;;  %v302_v8 = vmul.f32 %v479_v63, %v284_v3 }
 0x235   : > { %v318_v4 = vsel %vm303_vm2, %v317_v2, 0.0 }
 0x236   : > { %v298_v6 = vpop.xlane.xlu0 %297  ;;  %319 = vadd.xlane.f32.xlu0 %v318_v4  ;;  %v304_v10 = vsel %vm303_vm2, %v302_v8, 0.0 }
 0x237   : > { %v358_v7 = vsel %vm303_vm2, %v298_v6, 0.0 }
 0x238   : > { %359 = vadd.xlane.f32.xlu1 %v358_v7  ;;  %v294_v9 = vpop.xlane.xlu2 %293 }
 0x239   : > { %v338_v5 = vsel %vm303_vm2, %v294_v9, 0.0 }
 0x23c   : > { %305 = vadd.xlane.f32.xlu2 %v304_v10 }
 0x23e   : > { %339 = vadd.xlane.f32.xlu0 %v338_v5 }
 0x244   : > { %349 = vadd.xlane.f32.xlu2 %v348_v11 }
 0x246   : > { %369 = vadd.xlane.f32.xlu0 %v368_v12 }
 0x2a7   : > { %v330_v13 = vpop.xlane.xlu2 %329 }
 0x2a8   : > { %v331_v14 = vrot.slane %v330_v13, 4 }
 0x2a9   : > { %v320_v15 = vpop.xlane.xlu0 %319 }
 0x2aa   : > { %v321_v16 = vrot.slane %v320_v15, 4  ;;  %v332_v17 = vadd.f32 %v331_v14, %v330_v13 }
 0x2ab   : > { %v360_v19 = vpop.xlane.xlu1 %359 }
 0x2ac   : > { %v322_v18 = vadd.f32 %v321_v16, %v320_v15  ;;  %v361_v21 = vrot.slane %v360_v19, 4  ;;  %v333_v23 = vrot.slane %v332_v17, 2 }
 0x2ae   : > { %v323_v20 = vrot.slane %v322_v18, 2  ;;  %v362_v28 = vadd.f32 %v361_v21, %v360_v19  ;;  %v334_v32 = vadd.f32 %v333_v23, %v332_v17 }
 0x2af   : > { %v306_v22 = vpop.xlane.xlu2 %305 }
 0x2b0   : > { %v307_v24 = vrot.slane %v306_v22, 4  ;;  %v324_v29 = vadd.f32 %v323_v20, %v322_v18  ;;  %v363_v35 = vrot.slane %v362_v28, 2  ;;  %v335_v40 = vrot.slane %v334_v32, 1 }
 0x2b1   : > { %v340_v25 = vpop.xlane.xlu0 %339 }
 0x2b2   : > { %v308_v26 = vadd.f32 %v307_v24, %v306_v22  ;;  %v341_v27 = vrot.slane %v340_v25, 4  ;;  %v325_v37 = vrot.slane %v324_v29, 1  ;;  %v364_v47 = vadd.f32 %v363_v35, %v362_v28 }
 0x2b3   : > { %v336_v51 = vadd.f32 %v335_v40, %v334_v32 }
 0x2b4   : > { %v309_v30 = vrot.slane %v308_v26, 2  ;;  %v342_v31 = vadd.f32 %v341_v27, %v340_v25  ;;  %v326_v48 = vadd.f32 %v325_v37, %v324_v29  ;;  %v365_v55 = vrot.slane %v364_v47, 1 }
 0x2b6   : > { %v343_v33 = vrot.slane %v342_v31, 2  ;;  %v310_v34 = vadd.f32 %v309_v30, %v308_v26  ;;  %v366_v60 = vadd.f32 %v365_v55, %v364_v47 }
 0x2b7   : > { %v350_v36 = vpop.xlane.xlu2 %349 }
 0x2b8   : > { %v351_v38 = vrot.slane %v350_v36, 4  ;;  %v311_v39 = vrot.slane %v310_v34, 1  ;;  %v344_v41 = vadd.f32 %v343_v33, %v342_v31 }
 0x2b9   : > { %v370_v42 = vpop.xlane.xlu0 %369 }
 0x2ba   : > { %v352_v43 = vadd.f32 %v351_v38, %v350_v36  ;;  %v371_v44 = vrot.slane %v370_v42, 4  ;;  %v312_v45 = vadd.f32 %v311_v39, %v310_v34  ;;  %v345_v46 = vrot.slane %v344_v41, 1 }
 0x2bc   : > { %v353_v49 = vrot.slane %v352_v43, 2  ;;  %v372_v50 = vadd.f32 %v371_v44, %v370_v42  ;;  %483 = vpush %v312_v45  ;;  %v346_v52 = vadd.f32 %v345_v46, %v344_v41 }
 0x2bd   : > { %485 = vpush %v326_v48 }
 0x2be   : > { %v354_v53 = vadd.f32 %v353_v49, %v352_v43  ;;  %v373_v54 = vrot.slane %v372_v50, 2  ;;  %487 = vpush %v336_v51 }
 0x2bf   : > { %489 = vpush %v346_v52 }
 0x2c0   : > { %v374_v56 = vadd.f32 %v373_v54, %v372_v50  ;;  %v355_v57 = vrot.slane %v354_v53, 1 }
 0x2c2   : > { %v356_v58 = vadd.f32 %v355_v57, %v354_v53  ;;  %v375_v59 = vrot.slane %v374_v56, 1 }
 0x2c4   : > { %491 = vpush %v356_v58  ;;  %v376_v61 = vadd.f32 %v375_v59, %v374_v56 }
 0x2c5   : > { %493 = vpush %v366_v60 }
 0x2c6   : > { %495 = vpush %v376_v61 }
 0x2ed   : > { %s782_s17 = spop %483 }
 0x2ee   : > { %s784_s18 = spop %485  ;;  %v397_v5 = vstv %s782_s17 }
 0x2ef   : > { %s488_s0 = spop %487  ;;  %v395_v9 = vstv %s784_s18  ;;  %s597_s18 = scalar_lea.hbm %s840_s4, 3 }
 0x2f0   : > { %s490_s25 = spop %489  ;;  %v393_v7 = vstv %s488_s0  ;;  %p599_p1 = scmp.lt.s32.totalorder %s597_s18, %s593_s15 }
 0x2f1   : > { %v391_v4 = vstv %s490_s25 }
 0x2f2   : > { %p600_p2 = por %p599_p1, %p598_p0 }
 0x2f4   : > { %p601_p3 = pnand %p600_p2, %p596_p13 }
 0x2f5   : > { %s492_s27 = spop %491 }
 0x2f6   : > { %s494_s6 = spop %493  ;;  %v389_v2 = vstv %s492_s27 }
 0x2f7   : > { %s496_s7 = spop %495  ;;  %v387_v63 = vstv %s494_s6 }
 0x2f8   : > { %v385_v62 = vstv %s496_s7 }
 0x2f9   : > { %v386_v0 = vsel %vm384_vm3, %v385_v62, 0.0 }
 0x2fa   : > { %v388_v3 = vsel %vm383_vm4, %v387_v63, %v386_v0 }
 0x2fb   : > { %v390_v6 = vsel %vm382_vm5, %v389_v2, %v388_v3 }
 0x2fc   : > { %v392_v8 = vsel %vm381_vm6, %v391_v4, %v390_v6 }
 0x2fd   : > { %v394_v10 = vsel %vm380_vm7, %v393_v7, %v392_v8 }
 0x2fe   : > { %v396_v11 = vsel %vm379_vm8, %v395_v9, %v394_v10 }
 0x2ff   : > { %v398_v12 = vsel %vm378_vm9, %v397_v5, %v396_v11 }
 0x300   : > { %399 = vst [vmem:[%s170_s11] sm:$0x1] %v398_v12 }
 0x301   : > { %604 = shalt.err (!%p601_p3)
}
 0x302   : > { %497 = dma.vmem_to_hbm [thread:$0]  (%p731_p4), %s413_s12, 16, %s415_s13, %s401_s22  }
 0x303 PF: > { %p503_p5 = scmp.ge.s32.totalorder %s657_s24, 2  ;;  %s426_s27 = sand.u32 1, %s637_s19  }
 0x304   : > { %s427_s29 = scalar_lea.sflag [#allocation5], %s426_s27 }
 0x305   : > { %p500_p6 = pnand %p503_p5, %p738_p8 }
 0x307   : > { %p501_p7 = pneg %p500_p6 }
 0x309   : > { %632 = dma.done.wait (%p501_p7), %s427_s29, 16  }
 0x30a   : > { %634 = vsyncadd (%p501_p7), %s427_s29, 4294967280  ;;  %s25_s24 = sadd.s32 1, %s657_s24   ;;  %s843_s19 = smov %s641_s20 }
 0x30b   : > { %p22_p9 = scmp.ge.s32.totalorder %s25_s24, 5   ;;  %s844_s20 = smov %s645_s21 }
 0x30c   : > { %s845_s21 = smov %s744_s5  ;;  %s846_s22 = smov %s653_s23 }
 0x30d   : > { %s847_s23 = smov %s849_s26  ;;  %24 = sbr.rel (!%p22_p9) target bundleno = 10 (0xa), region = 66 }
 0x312   :  { %432 = vsyncpa [#allocation5], 1 }
 0x313   :  { %434 = vsyncpa [#allocation5 + $0x1], 1 }

</bundles_post_ra>
